<compile_context>
chip_gen: v7x
topology: tpu7x:2x2x1
jax: 0.10.0
libtpu: 0.0.40
codegen_flags: <defaults>
</compile_context>

<pallas_src>
import functools

import jax
import jax.numpy as jnp
from jax.experimental import pallas as pl
from jax.experimental.pallas import tpu as pltpu

IN_FEATURES = 128
NUM_CLASSES = 2
TB_MAX = 8192  # rows of x per grid step (f32: 4 MiB/buffer, 8 MiB double-buffered)


def _loss_kernel(x_ref, wd_ref, bd_ref, lab_ref, out_ref, *, true_b, tb):
    # x_ref:   (tb, 128)  VMEM   activations (input dtype, double-buffered)
    # wd_ref:  (128, 1)   VMEM   weight[1] - weight[0]   (f32, resident)
    # bd_ref:  (1, 1)     SMEM   bias[1]   - bias[0]     (f32 scalar)
    # lab_ref: (1, tb)    VMEM   labels as f32 in {0., 1.}, lane-dense
    # out_ref: (1, 128)   VMEM   this tile's partial loss sum (splatted across lanes)
    i = pl.program_id(0)
    last = pl.num_programs(0) - 1

    x = x_ref[...]
    if x.dtype != jnp.float32:          # trace-time: no-op for f32 inputs
        x = x.astype(jnp.float32)
    d = jnp.dot(x, wd_ref[...], preferred_element_type=jnp.float32)   # (tb, 1)
    d = d + bd_ref[0, 0]

    # Numerically stable 2-class CE: loss = softplus(d) - y*d, d = logit1 - logit0.
    sp = jnp.maximum(d, 0.0) + jnp.log(1.0 + jnp.exp(-jnp.abs(d)))    # (tb, 1)
    y = lab_ref[...]                                                   # (1, tb)

    @pl.when(i != last)
    def _():  # full tile: no masking work at all
        lab_term = jnp.dot(y, d, preferred_element_type=jnp.float32)   # (1, 1)
        out_ref[...] = jnp.broadcast_to(jnp.sum(sp) - lab_term, (1, 128))

    @pl.when(i == last)
    def _():  # final tile: rows past true_b are undefined block padding -> mask both terms
        rem = true_b - i * tb                                           # valid rows here
        rows = jax.lax.broadcasted_iota(jnp.int32, (tb, 1), 0)
        lanes = jax.lax.broadcasted_iota(jnp.int32, (1, tb), 1)
        sp_m = jnp.where(rows < rem, sp, 0.0)
        d_m = jnp.where(rows < rem, d, 0.0)
        y_m = jnp.where(lanes < rem, y, 0.0)
        lab_term = jnp.dot(y_m, d_m, preferred_element_type=jnp.float32)
        out_ref[...] = jnp.broadcast_to(jnp.sum(sp_m) - lab_term, (1, 128))


def lossA_forward(x, labels, weight, bias, *, tb=None):
    """x: (B, 1, 128), labels: (B,) int, weight: (2, 128), bias: (2,). Returns scalar f32.

    tb (optional override, e.g. for tests) must be a multiple of 128 if tb < B.
    """
    x2d = jnp.squeeze(x, axis=1)                                   # (B, 128), keep dtype
    B = x2d.shape[0]

    # Weight/bias diffs stay f32 (matches the all-f32 PyTorch reference exactly).
    wd = (weight[1] - weight[0]).astype(jnp.float32).reshape(IN_FEATURES, 1)
    bd = (bias[1] - bias[0]).astype(jnp.float32).reshape(1, 1)
    lab = labels.astype(jnp.float32).reshape(1, B)                 # lane-dense (1, B)

    if tb is None:
        tb = B if B <= TB_MAX else TB_MAX                          # single full-array block
    tb = min(tb, B)                                                # or TB_MAX (mult. of 8/128)
    num_tiles = -(-B // tb)                                        # ceil-div, no jnp.pad

    kernel = functools.partial(_loss_kernel, true_b=B, tb=tb)
    partials = pl.pallas_call(
        kernel,
        out_shape=jax.ShapeDtypeStruct((1, num_tiles * 128), jnp.float32),
        grid=(num_tiles,),
        in_specs=[
            pl.BlockSpec((tb, IN_FEATURES), lambda i: (i, 0)),     # x tile (double-buffered)
            pl.BlockSpec((IN_FEATURES, 1), lambda i: (0, 0)),      # weight diff (resident)
            pl.BlockSpec(memory_space=pltpu.SMEM),                 # bias-diff scalar
            pl.BlockSpec((1, tb), lambda i: (0, i)),               # labels, lane-dense
        ],
        # Per-tile, lane-dense partial sums -> no cross-step dependence, 2-TC safe.
        out_specs=pl.BlockSpec((1, 128), lambda i: (0, i)),
        compiler_params=pltpu.CompilerParams(
            dimension_semantics=("parallel",),
            vmem_limit_bytes=32 << 20,
        ),
    )(x2d, wd, bd, lab)

    # Each (1,128) out block holds one tile's sum splatted across its lanes.
    tile_sums = partials.reshape(num_tiles, 128)[:, 0]
    return (jnp.sum(tile_sums) / jnp.float32(B)).astype(jnp.float32)


def _reference(x, labels, weight, bias):
    x2d = jnp.squeeze(x, axis=1).astype(jnp.float32)
    logits = x2d @ weight.T.astype(jnp.float32) + bias.astype(jnp.float32)
    logp = jax.nn.log_softmax(logits, axis=-1)
    nll = -jnp.take_along_axis(logp, labels[:, None].astype(jnp.int32), axis=-1)
    return jnp.mean(nll)


if __name__ == "__main__":
    key = jax.random.PRNGKey(0)
    kx, kw, kb = jax.random.split(key, 3)

    # Deterministic nn.Linear(128, 2)-style init: U(-1/sqrt(fan_in), 1/sqrt(fan_in)).
    bound = 1.0 / (IN_FEATURES ** 0.5)
    weight = jax.random.uniform(kw, (NUM_CLASSES, IN_FEATURES),
                                minval=-bound, maxval=bound, dtype=jnp.float32)
    bias = jax.random.uniform(kb, (NUM_CLASSES,),
                              minval=-bound, maxval=bound, dtype=jnp.float32)

    # (B, tb_override) — exercises: single tile, odd batch, multi-tile "parallel"
    # partial sums, and the masked remainder tile (300 = 2*128 + 44).
    cases = [(8, None), (10, None), (256, 128), (300, 128)]
    for B, tb in cases:
        kxb, klb = jax.random.split(jax.random.fold_in(kx, B))
        x = jax.random.normal(kxb, (B, 1, IN_FEATURES), dtype=jnp.float32)
        labels = jax.random.randint(klb, (B,), 0, NUM_CLASSES, dtype=jnp.int32)

        loss = jax.block_until_ready(lossA_forward(x, labels, weight, bias, tb=tb))
        ref = jax.block_until_ready(_reference(x, labels, weight, bias))
        assert jnp.allclose(loss, ref, atol=1e-5, rtol=1e-5), (B, tb, loss, ref)

    print("KERNEL_OK")
</pallas_src>

<mosaic_0001>
module attributes {stable_mosaic.version = 11 : i64} {
  func.func @_loss_kernel(%arg0: i32, %arg1: memref<8x128xf32, #tpu.memory_space<vmem>>, %arg2: memref<128x1xf32, #tpu.memory_space<vmem>>, %arg3: memref<1x1xf32, #tpu.memory_space<smem>>, %arg4: memref<1x8xf32, #tpu.memory_space<vmem>>, %arg5: memref<1x128xf32, #tpu.memory_space<vmem>>) attributes {dimension_semantics = [#tpu.dimension_semantics<parallel>], iteration_bounds = array<i64: 1>, scalar_prefetch = 0 : i64, scratch_operands = 0 : i64, tpu.core_type = #tpu.core_type<tc>, window_params = [{transform_indices = @transform_0, window_bounds = array<i64: 8, 128>}, {pipeline_mode = #tpu.pipeline_mode<synchronous>, transform_indices = @transform_1, window_bounds = array<i64: 128, 1>}, {transform_indices = @transform_2, window_bounds = array<i64: 1, 1>}, {transform_indices = @transform_3, window_bounds = array<i64: 1, 8>}, {transform_indices = @transform_4, window_bounds = array<i64: 1, 128>}]} {
    %c0 = arith.constant 0 : index
    %c0_0 = arith.constant 0 : index
    %0 = vector.load %arg1[%c0, %c0_0] : memref<8x128xf32, #tpu.memory_space<vmem>>, vector<8x128xf32>
    %c0_1 = arith.constant 0 : index
    %c0_2 = arith.constant 0 : index
    %1 = vector.load %arg2[%c0_1, %c0_2] : memref<128x1xf32, #tpu.memory_space<vmem>>, vector<128x1xf32>
    %cst = arith.constant dense<0.000000e+00> : vector<8x1xf32>
    %2 = tpu.matmul %0, %1, %cst {dimension_numbers = #tpu.dot_dimension_numbers<[1], [0], [0], [1], [0, 0, 1, 1], [], []>} : vector<8x128xf32>, vector<128x1xf32>, vector<8x1xf32> -> vector<8x1xf32>
    %c0_3 = arith.constant 0 : index
    %c0_4 = arith.constant 0 : index
    %3 = memref.load %arg3[%c0_3, %c0_4] : memref<1x1xf32, #tpu.memory_space<smem>>
    %4 = vector.broadcast %3 : f32 to vector<8x1xf32>
    %5 = arith.addf %2, %4 : vector<8x1xf32>
    %cst_5 = arith.constant 0.000000e+00 : f32
    %6 = vector.broadcast %cst_5 : f32 to vector<8x1xf32>
    %7 = arith.maximumf %5, %6 : vector<8x1xf32>
    %8 = math.absf %5 : vector<8x1xf32>
    %cst_6 = arith.constant 0.000000e+00 : f32
    %9 = vector.broadcast %cst_6 : f32 to vector<8x1xf32>
    %10 = arith.subf %9, %8 : vector<8x1xf32>
    %11 = math.exp %10 : vector<8x1xf32>
    %cst_7 = arith.constant 1.000000e+00 : f32
    %12 = vector.broadcast %cst_7 : f32 to vector<8x1xf32>
    %13 = arith.addf %12, %11 : vector<8x1xf32>
    %14 = math.log %13 : vector<8x1xf32>
    %15 = arith.addf %7, %14 : vector<8x1xf32>
    %c0_8 = arith.constant 0 : index
    %c0_9 = arith.constant 0 : index
    %16 = vector.load %arg4[%c0_8, %c0_9] : memref<1x8xf32, #tpu.memory_space<vmem>>, vector<1x8xf32>
    %c0_i32 = arith.constant 0 : i32
    %17 = arith.cmpi ne, %arg0, %c0_i32 : i32
    %18 = arith.extui %17 : i1 to i32
    %c0_i32_10 = arith.constant 0 : i32
    %19 = arith.cmpi ne, %18, %c0_i32_10 : i32
    scf.if %19 {
      %cst_13 = arith.constant dense<0.000000e+00> : vector<1x1xf32>
      %23 = tpu.matmul %16, %5, %cst_13 {dimension_numbers = #tpu.dot_dimension_numbers<[1], [0], [0], [1], [0, 0, 1, 1], [], []>} : vector<1x8xf32>, vector<8x1xf32>, vector<1x1xf32> -> vector<1x1xf32>
      %24 = vector.shape_cast %15 : vector<8x1xf32> to vector<1x8x1xf32>
      %cst_14 = arith.constant dense<0.000000e+00> : vector<1xf32>
      %25 = vector.multi_reduction <add>, %24, %cst_14 [1, 2] : vector<1x8x1xf32> to vector<1xf32>
      %26 = vector.shape_cast %25 : vector<1xf32> to vector<1x1x1xf32>
      %27 = vector.extract %26[0, 0, 0] : f32 from vector<1x1x1xf32>
      %28 = vector.broadcast %27 : f32 to vector<1x1xf32>
      %29 = arith.subf %28, %23 : vector<1x1xf32>
      %30 = vector.shape_cast %29 : vector<1x1xf32> to vector<1x1xf32>
      %31 = vector.broadcast %30 : vector<1x1xf32> to vector<1x128xf32>
      %c0_15 = arith.constant 0 : index
      %c0_16 = arith.constant 0 : index
      %32 = vector.load %arg5[%c0_15, %c0_16] : memref<1x128xf32, #tpu.memory_space<vmem>>, vector<1x128xf32>
      tpu.vector_store %arg5[%c0_15, %c0_16], %31 {strides = array<i32>} : memref<1x128xf32, #tpu.memory_space<vmem>>, vector<1x128xf32>,
    } else {
    }
    %c0_i32_11 = arith.constant 0 : i32
    %20 = arith.cmpi eq, %arg0, %c0_i32_11 : i32
    %21 = arith.extui %20 : i1 to i32
    %c0_i32_12 = arith.constant 0 : i32
    %22 = arith.cmpi ne, %21, %c0_i32_12 : i32
    scf.if %22 {
      %c8_i32 = arith.constant 8 : i32
      %23 = arith.muli %arg0, %c8_i32 : i32
      %c8_i32_13 = arith.constant 8 : i32
      %24 = arith.subi %c8_i32_13, %23 : i32
      %25 = tpu.iota {dimensions = array<i32: 0>} : vector<8x1xi32>
      %26 = tpu.iota {dimensions = array<i32: 1>} : vector<1x8xi32>
      %27 = vector.broadcast %24 : i32 to vector<8x1xi32>
      %28 = arith.cmpi slt, %25, %27 : vector<8x1xi32>
      %cst_14 = arith.constant 0.000000e+00 : f32
      %29 = vector.broadcast %cst_14 : f32 to vector<8x1xf32>
      %30 = arith.select %28, %15, %29 : vector<8x1xi1>, vector<8x1xf32>
      %31 = vector.broadcast %24 : i32 to vector<8x1xi32>
      %32 = arith.cmpi slt, %25, %31 : vector<8x1xi32>
      %cst_15 = arith.constant 0.000000e+00 : f32
      %33 = vector.broadcast %cst_15 : f32 to vector<8x1xf32>
      %34 = arith.select %32, %5, %33 : vector<8x1xi1>, vector<8x1xf32>
      %35 = vector.broadcast %24 : i32 to vector<1x8xi32>
      %36 = arith.cmpi slt, %26, %35 : vector<1x8xi32>
      %cst_16 = arith.constant 0.000000e+00 : f32
      %37 = vector.broadcast %cst_16 : f32 to vector<1x8xf32>
      %38 = arith.select %36, %16, %37 : vector<1x8xi1>, vector<1x8xf32>
      %cst_17 = arith.constant dense<0.000000e+00> : vector<1x1xf32>
      %39 = tpu.matmul %38, %34, %cst_17 {dimension_numbers = #tpu.dot_dimension_numbers<[1], [0], [0], [1], [0, 0, 1, 1], [], []>} : vector<1x8xf32>, vector<8x1xf32>, vector<1x1xf32> -> vector<1x1xf32>
      %40 = vector.shape_cast %30 : vector<8x1xf32> to vector<1x8x1xf32>
      %cst_18 = arith.constant dense<0.000000e+00> : vector<1xf32>
      %41 = vector.multi_reduction <add>, %40, %cst_18 [1, 2] : vector<1x8x1xf32> to vector<1xf32>
      %42 = vector.shape_cast %41 : vector<1xf32> to vector<1x1x1xf32>
      %43 = vector.extract %42[0, 0, 0] : f32 from vector<1x1x1xf32>
      %44 = vector.broadcast %43 : f32 to vector<1x1xf32>
      %45 = arith.subf %44, %39 : vector<1x1xf32>
      %46 = vector.shape_cast %45 : vector<1x1xf32> to vector<1x1xf32>
      %47 = vector.broadcast %46 : vector<1x1xf32> to vector<1x128xf32>
      %c0_19 = arith.constant 0 : index
      %c0_20 = arith.constant 0 : index
      %48 = vector.load %arg5[%c0_19, %c0_20] : memref<1x128xf32, #tpu.memory_space<vmem>>, vector<1x128xf32>
      tpu.vector_store %arg5[%c0_19, %c0_20], %47 {strides = array<i32>} : memref<1x128xf32, #tpu.memory_space<vmem>>, vector<1x128xf32>,
    } else {
    }
    return
  }
  func.func @transform_0(%arg0: i32) -> (i32, i32) {
    %c0_i32 = arith.constant 0 : i32
    %c0_i32_0 = arith.constant 0 : i32
    return %arg0, %c0_i32 : i32, i32
  }
  func.func @transform_1(%arg0: i32) -> (i32, i32) {
    %c0_i32 = arith.constant 0 : i32
    %c0_i32_0 = arith.constant 0 : i32
    %c0_i32_1 = arith.constant 0 : i32
    return %c0_i32, %c0_i32_0 : i32, i32
  }
  func.func @transform_2(%arg0: i32) -> (i32, i32) {
    %c0_i32 = arith.constant 0 : i32
    %c0_i32_0 = arith.constant 0 : i32
    %c0_i32_1 = arith.constant 0 : i32
    return %c0_i32, %c0_i32_0 : i32, i32
  }
  func.func @transform_3(%arg0: i32) -> (i32, i32) {
    %c0_i32 = arith.constant 0 : i32
    %c0_i32_0 = arith.constant 0 : i32
    return %c0_i32, %arg0 : i32, i32
  }
  func.func @transform_4(%arg0: i32) -> (i32, i32) {
    %c0_i32 = arith.constant 0 : i32
    %c0_i32_0 = arith.constant 0 : i32
    return %c0_i32, %arg0 : i32, i32
  }
}

</mosaic_0001>

<bundles_post_ra>
// kernel: tpu_custom_call.1
= control target key start
LH: loop header
LB: loop body
LE: loop exit
PB: predicated region body
PF: predicated region fallthrough
CT: control target
= control target key end

     0   :  { %v459_v3 = vmov 0.0|0.0   ;;  %vm460_vm0 = vmmov 0   ;;  %v461_v6 = vmov 0.0   ;;  %s558_s0 = inlined_call_operand.vmem [shape: f32[8,128], index: 0, kind: input, shape index: {}]   ;;  %s559_s1 = inlined_call_operand.vmem [shape: f32[128,1], index: 1, kind: input, shape index: {}]   ;;  %s560_s2 = inlined_call_operand.<no memory space> [shape: f32[1,1], index: 2, kind: input, shape index: {}]   ;;  %s561_s3 = inlined_call_operand.vmem [shape: f32[1,8], index: 3, kind: input, shape index: {}]   ;;  %s562_s4 = inlined_call_operand.hbm [shape: f32[1,128], index: 4, kind: output, shape index: {}]  }
   0x1   :  { %v20_v0 = vld [vmem:[%s559_s1] sm:$0xff]  ;;  %v21_v1 = vld [vmem:[%s559_s1 + $0x8] sm:$0xff]  ;;  %v22_v2 = vld [vmem:[%s559_s1 + $0x10] sm:$0xff]  ;;  %399 = vmatprep.subr.bf16.mxu0 %v459_v3  ;;  %391 = vmatprep.mubr.msk.f32.mxu0 %vm460_vm0, %v461_v6 }
   0x2   :  { %v400_v4 = vpack.c.bf16 %v21_v1, %v20_v0  ;;  %v23_v5 = vld [vmem:[%s559_s1 + $0x18] sm:$0xff]  ;;  %394 = vmatprep.subr.mxu1 %v461_v6  ;;  %396 = vmatprep.mubr.msk.f32.mxu1 %vm460_vm0, %v461_v6  ;;  %v24_v8 = vld [vmem:[%s559_s1 + $0x20] sm:$0xff]  ;;  %v25_v9 = vld [vmem:[%s559_s1 + $0x28] sm:$0xff] }
   0x3   :  { %v403_v7 = vpack.c.bf16 %v23_v5, %v22_v2 }
   0x4   :  { %401 = vmatpush3.bf16.msra.mxu0 %v400_v4 }
   0x5   :  { %402 = vmatprep.subr.bf16.mxu0 %v459_v3 }
   0x6   :  { %10 = vsyncpa [#allocation4], 0  ;;  %v406_v10 = vpack.c.bf16 %v25_v9, %v24_v8  ;;  %v26_v11 = vld [vmem:[%s559_s1 + $0x30] sm:$0xff]  ;;  %v27_v12 = vld [vmem:[%s559_s1 + $0x38] sm:$0xff]  ;;  %v223_v27 = vlaneseq  ;;  %v37_v29 = vstv %s560_s2  ;;  %vm231_vm2 = vcmask 64512  }
   0x7   :  { %v409_v13 = vpack.c.bf16 %v27_v12, %v26_v11  ;;  %v28_v14 = vld [vmem:[%s559_s1 + $0x40] sm:$0xff]  ;;  %v29_v15 = vld [vmem:[%s559_s1 + $0x48] sm:$0xff]  ;;  %v30_v17 = vld [vmem:[%s559_s1 + $0x50] sm:$0xff]  ;;  %vm305_vm3 = vcmask 7168   ;;  %v462_v45 = vmov 0  }
   0x8   :  { %404 = vmatpush3.bf16.msra.mxu0 %v403_v7  ;;  %v412_v16 = vpack.c.bf16 %v29_v15, %v28_v14  ;;  %v31_v18 = vld [vmem:[%s559_s1 + $0x58] sm:$0xff]  ;;  %v32_v20 = vld [vmem:[%s559_s1 + $0x60] sm:$0xff]  ;;  %v33_v21 = vld [vmem:[%s559_s1 + $0x68] sm:$0xff]  ;;  %v224_v28 = vand.u32 127, %v223_v27  ;;  %430 = vset.pattern.permute.xlu0 %v462_v45 }
   0x9   :  { %405 = vmatprep.subr.bf16.mxu0 %v459_v3  ;;  %v415_v19 = vpack.c.bf16 %v31_v18, %v30_v17  ;;  %v418_v22 = vpack.c.bf16 %v33_v21, %v32_v20  ;;  %v34_v23 = vld [vmem:[%s559_s1 + $0x70] sm:$0xff]  ;;  %v35_v24 = vld [vmem:[%s559_s1 + $0x78] sm:$0xff]  ;;  %v19_v26 = vld [vmem:[%s558_s0] sm:$0xff]  ;;  %s463_s1 = smov [#allocation3]  }
   0xa   :  { %v421_v25 = vpack.c.bf16 %v35_v24, %v34_v23  ;;  %v117_v30 = vld [vmem:[%s561_s3] sm:$0x1]  ;;  %vm229_vm1 = vcmp.lt.s32.totalorder %v224_v28, 8  ;;  %s330_s2 = sshll.u32 %s463_s1, 4  ;;  %s331_s2 = int_to_ptr.vmem [resolvable:$true] %s330_s2 }
   0xb   :  { %v230_v34 = vsel %vm229_vm1, %v117_v30, 0.0  ;;  %s435_s3 = scalar_lea.vmem %s331_s2, 16  ;;  %s439_s27 = scalar_lea.vmem %s331_s2, 32 }
   0xc   :  { %407 = vmatpush3.bf16.msra.mxu0 %v406_v10  ;;  %p436_p0 = scmp.ne.s32.totalorder %s331_s2, %s435_s3  ;;  %p440_p1 = scmp.lt.s32.totalorder %s331_s2, %s331_s2 }
   0xd   :  { %408 = vmatprep.subr.bf16.mxu0 %v459_v3  ;;  %p441_p2 = scmp.lt.s32.totalorder %s439_s27, %s435_s3 }
   0xf   :  { %p442_p3 = por %p441_p2, %p440_p1 }
  0x10   :  { %410 = vmatpush3.bf16.msra.mxu0 %v409_v13 }
  0x11   :  { %411 = vmatprep.subr.bf16.mxu0 %v459_v3  ;;  %p443_p4 = pnand %p442_p3, %p436_p0 }
  0x14   :  { %413 = vmatpush3.bf16.msra.mxu0 %v412_v16 }
  0x15   :  { %414 = vmatprep.subr.bf16.mxu0 %v459_v3 }
  0x18   :  { %416 = vmatpush3.bf16.msra.mxu0 %v415_v19 }
  0x19   :  { %417 = vmatprep.subr.bf16.mxu0 %v459_v3 }
  0x1c   :  { %419 = vmatpush3.bf16.msra.mxu0 %v418_v22 }
  0x1d   :  { %420 = vmatprep.subr.bf16.mxu0 %v459_v3 }
  0x20   :  { %422 = vmatpush3.bf16.msra.mxu0 %v421_v25 }
  0x23   :  { %392 = vmatmul.mubr.f32.vlgmr.msra.gmra.mrb[0].mxu0 %v19_v26 }
  0xf6   :  { %v104_v31 = vpop.f32.mrb[0].mxu0 }
  0xf7   :  { %v105_v32 = vadd.f32 %v104_v31, %v37_v29  ;;  %v393_v33 = vpop.f32.mrb[1].mxu0 }
  0xf9   :  { %v109_v35 = vand.u32 2147483647, %v105_v32  ;;  %395 = vmatpush3.msra.mxu1 %v105_v32  ;;  %v108_v41 = vmax.f32 %v105_v32, 0.0 }
  0xfa   :  { %397 = vmatmul.mubr.msk.f32.vlgmr.msra.gmra.mrb[0].mxu1 %vm231_vm2, %v230_v34 }
  0xfb   :  { %v110_v36 = vsub.f32 0.0, %v109_v35 }
  0xfd   :  { %v111_v37 = vmul.f32 1.442695, %v110_v36 }
  0xff   :  { %431 = vpow2.f32 %v111_v37 }
 0x109   :  { %v432_v38 = vpop.eup %431 }
 0x10a   :  { %v113_v39 = vadd.f32 1.0, %v432_v38 }
 0x10c   :  { %433 = vlog2.f32 %v113_v39 }
 0x116   :  { %v434_v40 = vpop.eup %433 }
 0x117   :  { %v115_v42 = vmul.f32 0.6931472, %v434_v40 }
 0x119   :  { %v116_v43 = vadd.f32 %v115_v42, %v108_v41 }
 0x11b   :  { %v306_v44 = vsel %vm305_vm3, %v116_v43, 0.0 }
 0x11c   :  { %307 = vadd.xlane.f32.xlu0 %v306_v44 }
 0x1a9   :  { %v308_v46 = vpop.xlane.xlu0 %307 }
 0x1aa   :  { %v309_v47 = vrot.slane %v308_v46, 4 }
 0x1ac   :  { %v310_v48 = vadd.f32 %v309_v47, %v308_v46 }
 0x1ae   :  { %v311_v49 = vrot.slane %v310_v48, 2 }
 0x1b0   :  { %v312_v50 = vadd.f32 %v311_v49, %v310_v48 }
 0x1b2   :  { %v313_v51 = vrot.slane %v312_v50, 1 }
 0x1b4   :  { %v314_v52 = vadd.f32 %v313_v51, %v312_v50 }
 0x1b6   :  { %423 = vpush %v314_v52 }
 0x1cd   :  { %v301_v53 = vpop.f32.mrb[0].mxu1 }
 0x1ce   :  { %v398_v54 = vpop.f32.mrb[1].mxu1 }
 0x1e7   :  { %s424_s0 = spop %423 }
 0x1e8   :  { %v316_v55 = vstv %s424_s0 }
 0x1e9   :  { %v317_v56 = vsub.f32 %v316_v55, %v301_v53 }
 0x1eb   :  { %320 = vperm.xlu0 %430, %v317_v56  }
 0x26a   :  { %v321_v57 = vpop.permute.xlu0 %320 }
 0x26b   :  { %323 = vst [vmem:[#allocation3] sm:$0x1] %v321_v57 }
 0x26c   :  { %446 = shalt.err (!%p443_p4)
}
 0x26d   :  { %s447_s30 = scalar_lea.hbm %s562_s4, 16 }
 0x26e   :  { %p448_p5 = scmp.ne.s32.totalorder %s562_s4, %s447_s30  ;;  %p451_p6 = scmp.lt.u32.totalorder %s447_s30, %s562_s4 }
 0x270   :  { %p453_p7 = pnand %p451_p6, %p448_p5 }
 0x272   :  { %456 = shalt.err (!%p453_p7)
}
 0x273   :  { %333 = dma.vmem_to_hbm [thread:$0]  %s331_s2, 16, %s562_s4, [#allocation4]  }
 0x274   :  { %457 = dma.done.wait [#allocation4], 16  }
 0x275   :  { %458 = vsyncadd [#allocation4], 4294967280 }
 0x276   :  { %337 = vsyncpa [#allocation4], 1 }

</bundles_post_ra>
